<compile_context>
chip_gen: v6e
topology: v6e:2x2x1
jax: 0.10.0
libtpu: 0.0.40
codegen_flags: <defaults>
</compile_context>

<pallas_src>
import jax
import jax.numpy as jnp
from jax.experimental import pallas as pl
from jax.experimental.pallas import tpu as pltpu

ENT_CLASSES = 4  # != 3 so the module's in-script cfg construction applies (no json file)

_LANE = 128      # lane-dense last dim; minimum for unmasked vst


def _entropy_curriculum_kernel(table_ref, ent_ref, conf_ref):
    """conf = table[ent] over one (rows, 128) tile via a select chain.

    table_ref: SMEM f32[n_classes] = sigmoid(c1*(tp - c2)) per class.
    ent_ref:   VMEM int32 tile of class ids.
    Per output vreg: 1 vld + (n_classes-1) x (cmp, select) + 1 vst.
    Any value not in {1..n_classes-1} (incl. garbage in masked partial blocks)
    falls through to class 0's value, so the table is never indexed OOB.
    """
    ent = ent_ref[...]                                   # native int32, no cast
    n_classes = table_ref.shape[0]                       # static

    acc = jnp.full(ent.shape, table_ref[0], dtype=jnp.float32)
    for i in range(1, n_classes):
        acc = jnp.where(ent == i, table_ref[i], acc)

    conf_ref[...] = acc.astype(conf_ref.dtype)


def _pick_rows_per_block(n_rows):
    """Rows per (rows, 128) block: multiples of 8, sized so the double-buffered
    int32-in + f32-out footprint stays <= ~8 MiB (under v5e's 16 MiB scoped
    default), with enough blocks to feed both v7x TensorCores."""
    if n_rows >= 32768:      # >= 4M elems: 512K-elem blocks, >= 8 blocks
        return 4096
    if n_rows >= 4096:       # >= 512K elems: 128K-elem blocks, 4..32 blocks
        return 1024
    if n_rows >= 512:        # >= 64K elems: 32K-elem blocks, >= 2 blocks
        return 256
    return 8                 # tiny forced-kernel batches: minimal padding


def entropy_curriculum_forward(loss, training_progress, ent_class, c1_table, c2_table,
                               *, out_dtype=jnp.float32, min_pallas_elems=65536):
    """JAX wrapper. `loss` is unused on the avgloss=False path (kept for API fidelity)."""
    del loss
    B = ent_class.shape[0]
    n_classes = c1_table.shape[0]
    tp = jnp.float32(training_progress)

    # Per-class result table: sigmoid runs n_classes times total, not per element.
    table = jax.nn.sigmoid(c1_table.astype(jnp.float32) * (tp - c2_table.astype(jnp.float32)))

    # Small batches: a fused 4-entry XLA gather beats any kernel launch.
    if B < min_pallas_elems:
        idx = jnp.clip(ent_class.astype(jnp.int32), 0, n_classes - 1)
        return table[idx].astype(out_dtype)

    ent = ent_class.astype(jnp.int32)                 # no-op for int32 callers
    n_rows = pl.cdiv(B, _LANE)
    n_pad = n_rows * _LANE
    if n_pad != B:
        ent = jnp.pad(ent, (0, n_pad - B))            # <=127 extra elems, sliced off below
    ent2d = ent.reshape(n_rows, _LANE)

    rows_per_block = _pick_rows_per_block(n_rows)
    n_blocks = pl.cdiv(n_rows, rows_per_block)        # partial last block is masked by Pallas

    conf2d = pl.pallas_call(
        _entropy_curriculum_kernel,
        out_shape=jax.ShapeDtypeStruct((n_rows, _LANE), out_dtype),
        grid=(n_blocks,),
        in_specs=[
            pl.BlockSpec(memory_space=pltpu.MemorySpace.SMEM),            # sigmoid table
            pl.BlockSpec((rows_per_block, _LANE), lambda r: (r, 0)),      # ent tile (VMEM)
        ],
        out_specs=pl.BlockSpec((rows_per_block, _LANE), lambda r: (r, 0)),  # conf tile (VMEM)
        compiler_params=pltpu.CompilerParams(
            dimension_semantics=("parallel",),        # shard row-blocks across v7x's 2 TCs
        ),
    )(table, ent2d)

    return conf2d.reshape(n_pad)[:B]


if __name__ == "__main__":
    # Deterministic "parameters" from the module's __init__ (ent_classes != 3 branch):
    #   cfg[i] = {'c1': 50, 'c2': i / ent_classes}
    c1_table = jnp.full((ENT_CLASSES,), 50.0, dtype=jnp.float32)
    c2_table = jnp.arange(ENT_CLASSES, dtype=jnp.float32) / ENT_CLASSES

    key = jax.random.PRNGKey(0)
    k_loss, k_ent, k_ent2 = jax.random.split(key, 3)
    training_progress = 0.37

    def ref_fn(ent):
        return jax.nn.sigmoid(c1_table[ent] * (training_progress - c2_table[ent]))

    # Case 1: small batch, multiple of 128 -- force the Pallas kernel path.
    B1 = 256
    loss1 = jax.random.normal(k_loss, (B1,), dtype=jnp.float32)      # unused (avgloss=False)
    ent1 = jax.random.randint(k_ent, (B1,), 0, ENT_CLASSES, dtype=jnp.int32)
    conf1 = entropy_curriculum_forward(loss1, training_progress, ent1,
                                       c1_table, c2_table, min_pallas_elems=0)
    conf1 = jax.block_until_ready(conf1)
    assert conf1.shape == (B1,) and conf1.dtype == jnp.float32
    assert jnp.allclose(conf1, ref_fn(ent1), atol=1e-6, rtol=1e-6)

    # Case 2: non-multiple-of-128 batch -- exercises lane padding + masked partial block.
    B2 = 300
    loss2 = jnp.zeros((B2,), dtype=jnp.float32)
    ent2 = jax.random.randint(k_ent2, (B2,), 0, ENT_CLASSES, dtype=jnp.int32)
    conf2 = entropy_curriculum_forward(loss2, training_progress, ent2,
                                       c1_table, c2_table, min_pallas_elems=0)
    conf2 = jax.block_until_ready(conf2)
    assert conf2.shape == (B2,) and jnp.allclose(conf2, ref_fn(ent2), atol=1e-6, rtol=1e-6)

    # Case 3: default cutoff -> fused XLA table-gather fallback for tiny batches.
    conf3 = jax.block_until_ready(
        entropy_curriculum_forward(loss1, training_progress, ent1, c1_table, c2_table))
    assert jnp.allclose(conf3, ref_fn(ent1), atol=1e-6, rtol=1e-6)

    print("KERNEL_OK")
</pallas_src>

<mosaic_0001>
module attributes {stable_mosaic.version = 11 : i64} {
  func.func @_entropy_curriculum_kernel(%arg0: i32, %arg1: memref<4xf32, #tpu.memory_space<smem>>, %arg2: memref<8x128xi32, #tpu.memory_space<vmem>>, %arg3: memref<8x128xf32, #tpu.memory_space<vmem>>) attributes {dimension_semantics = [#tpu.dimension_semantics<parallel>], iteration_bounds = array<i64: 1>, scalar_prefetch = 0 : i64, scratch_operands = 0 : i64, tpu.core_type = #tpu.core_type<tc>, window_params = [{transform_indices = @transform_0, window_bounds = array<i64: 4>}, {transform_indices = @transform_1, window_bounds = array<i64: 8, 128>}, {transform_indices = @transform_2, window_bounds = array<i64: 8, 128>}]} {
    %c0 = arith.constant 0 : index
    %c0_0 = arith.constant 0 : index
    %0 = vector.load %arg2[%c0, %c0_0] : memref<8x128xi32, #tpu.memory_space<vmem>>, vector<8x128xi32>
    %c0_1 = arith.constant 0 : index
    %1 = memref.load %arg1[%c0_1] : memref<4xf32, #tpu.memory_space<smem>>
    %2 = vector.broadcast %1 : f32 to vector<8x128xf32>
    %c1_i32 = arith.constant 1 : i32
    %3 = vector.broadcast %c1_i32 : i32 to vector<8x128xi32>
    %4 = arith.cmpi eq, %0, %3 : vector<8x128xi32>
    %c1 = arith.constant 1 : index
    %5 = memref.load %arg1[%c1] : memref<4xf32, #tpu.memory_space<smem>>
    %6 = vector.broadcast %5 : f32 to vector<8x128xf32>
    %7 = arith.select %4, %6, %2 : vector<8x128xi1>, vector<8x128xf32>
    %c2_i32 = arith.constant 2 : i32
    %8 = vector.broadcast %c2_i32 : i32 to vector<8x128xi32>
    %9 = arith.cmpi eq, %0, %8 : vector<8x128xi32>
    %c2 = arith.constant 2 : index
    %10 = memref.load %arg1[%c2] : memref<4xf32, #tpu.memory_space<smem>>
    %11 = vector.broadcast %10 : f32 to vector<8x128xf32>
    %12 = arith.select %9, %11, %7 : vector<8x128xi1>, vector<8x128xf32>
    %c3_i32 = arith.constant 3 : i32
    %13 = vector.broadcast %c3_i32 : i32 to vector<8x128xi32>
    %14 = arith.cmpi eq, %0, %13 : vector<8x128xi32>
    %c3 = arith.constant 3 : index
    %15 = memref.load %arg1[%c3] : memref<4xf32, #tpu.memory_space<smem>>
    %16 = vector.broadcast %15 : f32 to vector<8x128xf32>
    %17 = arith.select %14, %16, %12 : vector<8x128xi1>, vector<8x128xf32>
    %c0_2 = arith.constant 0 : index
    %c0_3 = arith.constant 0 : index
    %18 = vector.load %arg3[%c0_2, %c0_3] : memref<8x128xf32, #tpu.memory_space<vmem>>, vector<8x128xf32>
    tpu.vector_store %arg3[%c0_2, %c0_3], %17 {strides = array<i32>} : memref<8x128xf32, #tpu.memory_space<vmem>>, vector<8x128xf32>,
    return
  }
  func.func @transform_0(%arg0: i32) -> i32 {
    %c0_i32 = arith.constant 0 : i32
    %c0_i32_0 = arith.constant 0 : i32
    return %c0_i32 : i32
  }
  func.func @transform_1(%arg0: i32) -> (i32, i32) {
    %c0_i32 = arith.constant 0 : i32
    %c0_i32_0 = arith.constant 0 : i32
    return %arg0, %c0_i32 : i32, i32
  }
  func.func @transform_2(%arg0: i32) -> (i32, i32) {
    %c0_i32 = arith.constant 0 : i32
    %c0_i32_0 = arith.constant 0 : i32
    return %arg0, %c0_i32 : i32, i32
  }
}

</mosaic_0001>

<bundles_post_ra>
// kernel: tpu_custom_call.1
= control target key start
LH: loop header
LB: loop body
LE: loop exit
PB: predicated region body
PF: predicated region fallthrough
CT: control target
= control target key end

     0   :  { %7 = vsyncpa [#allocation5], 0  ;;  %s168_s0 = inlined_call_operand.hbm [shape: f32[4], index: 0, kind: input, shape index: {}]   ;;  %s169_s1 = inlined_call_operand.hbm [shape: s32[2,128], index: 1, kind: input, shape index: {}]   ;;  %s170_s2 = inlined_call_operand.hbm [shape: f32[2,128], index: 2, kind: output, shape index: {}]  }
   0x1   :  { %8 = vsyncpa [#allocation3], 0 }
   0x2   :  { %9 = vsyncpa [#allocation4], 0  ;;  %s133_s9 = smov [#allocation2]  }
   0x3   :  { %17 = dma.hbm_to_smem %s168_s0, 16, %s133_s9, [#allocation5]  }
   0x4   :  { %22 = vsyncadd [#allocation3], 96  ;;  %s134_s12 = smov [#allocation6]  }
   0x5   :  { %s23_s13 = sshll.u32 %s134_s12, 4  ;;  %s24_s13 = int_to_ptr.vmem [resolvable:$true] %s23_s13 }
   0x6   :  { %s95_s14 = scalar_lea.vmem %s24_s13, 32  ;;  %s99_s15 = scalar_lea.vmem %s24_s13, 128 }
   0x7   :  { %p96_p0 = scmp.ne.s32.totalorder %s24_s13, %s95_s14  ;;  %p100_p1 = scmp.lt.s32.totalorder %s24_s13, %s24_s13 }
   0x8   :  { %p101_p2 = scmp.lt.s32.totalorder %s99_s15, %s95_s14 }
   0xa   :  { %p102_p3 = por %p101_p2, %p100_p1 }
   0xc   :  { %p103_p4 = pnand %p102_p3, %p96_p0 }
   0xe   :  { %106 = shalt.err (!%p103_p4)
}
   0xf   :  { %s135_s16 = smov 32   ;;  %s136_s17 = smov 2  }
  0x10   :  { %29 = dma.hbm_to_vmem [thread:$0]  %s169_s1, 32, %s24_s13, [#allocation3], %s135_s16, %s135_s16, %s136_s17  }
  0x11   :  { %127 = dma.done.wait [#allocation5], 16  }
  0x12   :  { %128 = vsyncadd [#allocation5], 4294967280 }
  0x13   :  { %129 = dma.done.wait [#allocation3], 128  }
  0x14   :  { %130 = vsyncadd [#allocation3], 4294967168 }
  0x15   :  { %36 = sfence }
  0x16   :  { %s38_s0 = sld [smem:[#allocation2]]  ;;  %v37_v0 = vld [vmem:[#allocation6] sm:$0xff] }
  0x17   :  { %s71_s20 = sld [smem:[#allocation2 + $0x1]]  ;;  %vm40_vm0 = vcmp.eq.s32.totalorder %v37_v0, 1  ;;  %vm44_vm1 = vcmp.eq.s32.totalorder %v37_v0, 2  ;;  %vm48_vm2 = vcmp.eq.s32.totalorder %v37_v0, 3 }
  0x18   :  { %s72_s21 = sld [smem:[#allocation2 + $0x2]] }
  0x19   :  { %s73_s22 = sld [smem:[#allocation2 + $0x3]] }
  0x1c   :  { %v39_v1 = vstv %s38_s0 }
  0x1d   :  { %v42_v2 = vstv %s71_s20 }
  0x1e   :  { %v43_v3 = vsel %vm40_vm0, %v42_v2, %v39_v1  ;;  %v46_v4 = vstv %s72_s21 }
  0x1f   :  { %v47_v5 = vsel %vm44_vm1, %v46_v4, %v43_v3  ;;  %v50_v6 = vstv %s73_s22 }
  0x20   :  { %v51_v7 = vsel %vm48_vm2, %v50_v6, %v47_v5 }
  0x21   :  { %52 = vst [vmem:[#allocation7] sm:$0xff] %v51_v7 }
  0x22   :  { %57 = vsyncadd [#allocation4], 96  ;;  %s137_s1 = smov [#allocation7]  }
  0x23   :  { %s58_s23 = sshll.u32 %s137_s1, 4  ;;  %s59_s23 = int_to_ptr.vmem [resolvable:$true] %s58_s23 }
  0x24   :  { %s107_s24 = scalar_lea.vmem %s59_s23, 32  ;;  %s111_s25 = scalar_lea.vmem %s59_s23, 128 }
  0x25   :  { %p108_p5 = scmp.ne.s32.totalorder %s59_s23, %s107_s24  ;;  %p112_p6 = scmp.lt.s32.totalorder %s59_s23, %s59_s23 }
  0x26   :  { %p113_p7 = scmp.lt.s32.totalorder %s111_s25, %s107_s24 }
  0x28   :  { %p114_p8 = por %p113_p7, %p112_p6 }
  0x2a   :  { %p115_p9 = pnand %p114_p8, %p108_p5 }
  0x2c   :  { %118 = shalt.err (!%p115_p9)
}
  0x2d   :  { %64 = dma.vmem_to_hbm [thread:$0]  %s59_s23, 32, %s170_s2, [#allocation4], %s135_s16, %s135_s16, %s136_s17  }
  0x2e   :  { %131 = dma.done.wait [#allocation4], 128  }
  0x2f   :  { %132 = vsyncadd [#allocation4], 4294967168 }
  0x30   :  { %68 = vsyncpa [#allocation3], 1 }
  0x31   :  { %69 = vsyncpa [#allocation4], 1 }
  0x32   :  { %70 = vsyncpa [#allocation5], 1 }

</bundles_post_ra>
